<compile_context>
chip_gen: v5e
topology: v5e:2x2
jax: 0.10.0
libtpu: 0.0.40
codegen_flags: <defaults>
</compile_context>

<pallas_src>
import functools

import jax
import jax.numpy as jnp
from jax.experimental import pallas as pl
from jax.experimental.pallas import tpu as pltpu

# get_Parameter('taxi_size') in the original code is a global config lookup;
# here it is a fixed in-script constant.
TAXI_SIZE = 4


def decoder_kernel(x_ref, fi_ref, ft_ref, w_ref, b_ref, mask_ref, o_ref, *,
                   out_dim):
    # x_ref, fi_ref : (T, F, R)   lanes = flattened (batch, node) rows
    # ft_ref        : (F, R)
    # w_ref         : (2*out_dim, F)  = [W1 | W2]^T
    # b_ref         : (2*out_dim, 1)  = [b1 | b2]^T
    # mask_ref      : (1, R)  1.0 where node < taxi_size else 0.0
    # o_ref         : (out_dim, R)    lane-dense output slab
    f32 = jnp.float32
    x = x_ref[...]
    fi = fi_ref[...]
    ft = ft_ref[...]
    # Up-cast only when needed (bf16 inputs stream half the HBM bytes; this
    # kernel is HBM-bandwidth bound).
    if x.dtype != f32:
        x = x.astype(f32)
    if fi.dtype != f32:
        fi = fi.astype(f32)
    if ft.dtype != f32:
        ft = ft.astype(f32)

    # Attention scores over time: sublane reduce over F -> (T, R).
    scores = jnp.sum(fi * ft[None, :, :], axis=1)

    # Numerically-stable softmax over T (axis 0).
    m = jnp.max(scores, axis=0, keepdims=True)
    e = jnp.exp(scores - m)
    denom = jnp.sum(e, axis=0, keepdims=True)
    # One exact reciprocal + multiplies (pl.reciprocal(denom, approx=True)
    # would move this to the idle EUP slot at reduced precision).
    attn = e * (1.0 / denom)                                   # (T, R)

    # Context: weighted sum over time -> (F, R).
    ctx = jnp.sum(x * attn[:, None, :], axis=0)

    # Fused heads, transposed: (2*out_dim, F) @ (F, R) -> lane-dense (2*out_dim, R).
    yy = jnp.dot(w_ref[...], ctx, preferred_element_type=f32) + b_ref[...]

    # Head select along lanes via the precomputed taxi mask (no `% N`).
    sel = mask_ref[...] > 0.5                                  # (1, R)
    y = jnp.where(sel, yy[:out_dim, :], yy[out_dim:2 * out_dim, :])

    o_ref[...] = y.astype(o_ref.dtype)


def _vmem_budget_bytes():
    """Generation-aware per-grid-step VMEM budget and explicit scoped limit."""
    try:
        cap = int(pltpu.get_tpu_info().vmem_capacity_bytes)
    except Exception:  # conservative fallback if the query is unavailable
        cap = 64 * 1024 * 1024
    # Scoped limit with headroom under the physical per-core VMEM
    # (v7x: 64 MiB/TC; v5e/v6e: 128 MiB but 16/32 MiB scoped by default).
    vmem_limit = min(cap * 3 // 4, 64 * 1024 * 1024)
    # Per-step working-set budget (double-buffered blocks + temporaries).
    budget = min(vmem_limit // 2, 28 * 1024 * 1024)
    return budget, vmem_limit


def _choose_lane_blocking(r_total, T, F, out_dim, budget):
    """Pick the lane-block size (multiple of 128) and padded lane total."""
    LANE = 128
    if r_total <= 2 * LANE:
        # Too small to split into >=2 lane-aligned blocks: single full block
        # (a full-extent lane dim is always a legal BlockSpec).
        return r_total, r_total
    r_pad = pl.cdiv(r_total, LANE) * LANE
    # f32 bytes resident per lane column per grid step: two streamed (T,F)
    # inputs + (F) target + mask + output, all double-buffered, plus one
    # (T,F)-sized elementwise temporary as headroom (lane-padding aware by
    # construction since lanes ARE the blocked axis).
    bytes_per_lane = 4 * (2 * (2 * T * F + F + 1 + out_dim) + T * F)
    max_blk = max(LANE, (budget // max(bytes_per_lane, 1)) // LANE * LANE)
    # Guarantee >=2 "parallel" grid steps when possible (v7x has 2 TensorCores).
    cap = max(LANE, (r_pad // 2) // LANE * LANE)
    blk = min(max_blk, cap, r_pad)
    r_pad = pl.cdiv(r_pad, blk) * blk
    return blk, r_pad


def decoder_forward(x, features_input, features_target, w1, b1, w2, b2,
                    taxi_size=TAXI_SIZE):
    B, T, N, F = x.shape
    out_dim = w1.shape[1]
    r_total = B * N

    # Rows (b, n) -> lane axis (n fastest); F -> sublanes; T leading.
    x_flat = jnp.transpose(x, (1, 3, 0, 2)).reshape(T, F, r_total)
    fi_flat = jnp.transpose(features_input, (1, 3, 0, 2)).reshape(T, F, r_total)
    ft_flat = jnp.transpose(features_target[:, 0], (2, 0, 1)).reshape(F, r_total)

    # Fuse the two linear heads into one transposed weight / bias.
    w_t = jnp.concatenate([w1.T, w2.T], axis=0)                 # (2*out_dim, F)
    b_t = jnp.concatenate([b1.reshape(out_dim, 1),
                           b2.reshape(out_dim, 1)], axis=0)     # (2*out_dim, 1)

    # Per-lane head-select mask (node index < taxi_size), precomputed once.
    node_mask = (jnp.arange(N) < taxi_size).astype(jnp.float32)
    mask = jnp.tile(node_mask, B).reshape(1, r_total)

    budget, vmem_limit = _vmem_budget_bytes()
    blk, r_pad = _choose_lane_blocking(r_total, T, F, out_dim, budget)

    if r_pad != r_total:
        pad = r_pad - r_total
        # Zero-padded lanes softmax to a uniform 1/T (no NaNs) and are sliced
        # off below; padding keeps every block lane-aligned to 128.
        x_flat = jnp.pad(x_flat, ((0, 0), (0, 0), (0, pad)))
        fi_flat = jnp.pad(fi_flat, ((0, 0), (0, 0), (0, pad)))
        ft_flat = jnp.pad(ft_flat, ((0, 0), (0, pad)))
        mask = jnp.pad(mask, ((0, 0), (0, pad)))

    grid = (r_pad // blk,)
    kernel = functools.partial(decoder_kernel, out_dim=out_dim)

    y_flat = pl.pallas_call(
        kernel,
        out_shape=jax.ShapeDtypeStruct((out_dim, r_pad), jnp.float32),
        grid=grid,
        in_specs=[
            pl.BlockSpec((T, F, blk), lambda i: (0, 0, i)),       # input
            pl.BlockSpec((T, F, blk), lambda i: (0, 0, i)),       # features_input
            pl.BlockSpec((F, blk), lambda i: (0, i)),             # features_target
            pl.BlockSpec((2 * out_dim, F), lambda i: (0, 0)),     # fused W^T (resident)
            pl.BlockSpec((2 * out_dim, 1), lambda i: (0, 0)),     # fused bias (resident)
            pl.BlockSpec((1, blk), lambda i: (0, i)),             # taxi mask
        ],
        out_specs=pl.BlockSpec((out_dim, blk), lambda i: (0, i)),
        compiler_params=pltpu.CompilerParams(
            dimension_semantics=("parallel",),
            vmem_limit_bytes=vmem_limit),
    )(x_flat, fi_flat, ft_flat, w_t, b_t, mask)

    y = y_flat[:, :r_total].reshape(out_dim, B, N)
    return jnp.transpose(y, (1, 2, 0))[:, None]                  # (B, 1, N, out_dim)


def decoder_reference(x, fi, ft, w1, b1, w2, b2, taxi_size=TAXI_SIZE):
    """Pure-JAX reference matching the PyTorch forward exactly."""
    scores = jnp.einsum('btnf,bnf->bnt', fi, ft[:, 0])       # (B, N, T)
    attn = jax.nn.softmax(scores, axis=-1)                   # softmax over T
    ctx = jnp.einsum('btnf,bnt->bnf', x, attn)               # (B, N, F)
    y1 = ctx[:, :taxi_size] @ w1 + b1                        # (B, taxi, 2)
    y2 = ctx[:, taxi_size:] @ w2 + b2                        # (B, N-taxi, 2)
    y = jnp.concatenate([y1, y2], axis=1)                    # (B, N, 2)
    return y[:, None]                                        # (B, 1, N, 2)


if __name__ == "__main__":
    batch, T, N, F = 2, 8, 8, 32
    out_dim = 2

    key = jax.random.PRNGKey(0)
    k1, k2, k3, k4, k5, k6, k7 = jax.random.split(key, 7)

    x = jax.random.normal(k1, (batch, T, N, F), dtype=jnp.float32)
    features_input = jax.random.normal(k2, (batch, T, N, F), dtype=jnp.float32)
    features_target = jax.random.normal(k3, (batch, 1, N, F), dtype=jnp.float32)

    # Deterministic "Linear" parameters (nn.Linear(F, 2)): W stored pre-transposed (F, 2).
    bound = 1.0 / jnp.sqrt(F)
    w1 = jax.random.uniform(k4, (F, out_dim), jnp.float32, -bound, bound)
    b1 = jax.random.uniform(k5, (1, out_dim), jnp.float32, -bound, bound)
    w2 = jax.random.uniform(k6, (F, out_dim), jnp.float32, -bound, bound)
    b2 = jax.random.uniform(k7, (1, out_dim), jnp.float32, -bound, bound)

    out = decoder_forward(x, features_input, features_target, w1, b1, w2, b2)
    out = jax.block_until_ready(out)

    ref = decoder_reference(x, features_input, features_target, w1, b1, w2, b2)
    assert out.shape == (batch, 1, N, out_dim), out.shape
    assert jnp.allclose(out, ref, atol=1e-5, rtol=1e-5), \
        f"max abs err {jnp.max(jnp.abs(out - ref))}"

    print("KERNEL_OK")
</pallas_src>

<mosaic_0001>
module attributes {stable_mosaic.version = 11 : i64} {
  func.func @decoder_kernel(%arg0: i32, %arg1: memref<8x32x16xf32, #tpu.memory_space<vmem>>, %arg2: memref<8x32x16xf32, #tpu.memory_space<vmem>>, %arg3: memref<32x16xf32, #tpu.memory_space<vmem>>, %arg4: memref<4x32xf32, #tpu.memory_space<vmem>>, %arg5: memref<4x1xf32, #tpu.memory_space<vmem>>, %arg6: memref<1x16xf32, #tpu.memory_space<vmem>>, %arg7: memref<2x16xf32, #tpu.memory_space<vmem>>) attributes {dimension_semantics = [#tpu.dimension_semantics<parallel>], iteration_bounds = array<i64: 1>, scalar_prefetch = 0 : i64, scratch_operands = 0 : i64, tpu.core_type = #tpu.core_type<tc>, window_params = [{transform_indices = @transform_0, window_bounds = array<i64: 8, 32, 16>}, {transform_indices = @transform_1, window_bounds = array<i64: 8, 32, 16>}, {transform_indices = @transform_2, window_bounds = array<i64: 32, 16>}, {pipeline_mode = #tpu.pipeline_mode<synchronous>, transform_indices = @transform_3, window_bounds = array<i64: 4, 32>}, {pipeline_mode = #tpu.pipeline_mode<synchronous>, transform_indices = @transform_4, window_bounds = array<i64: 4, 1>}, {transform_indices = @transform_5, window_bounds = array<i64: 1, 16>}, {transform_indices = @transform_6, window_bounds = array<i64: 2, 16>}]} {
    %c0 = arith.constant 0 : index
    %c0_0 = arith.constant 0 : index
    %c0_1 = arith.constant 0 : index
    %0 = vector.load %arg1[%c0, %c0_0, %c0_1] : memref<8x32x16xf32, #tpu.memory_space<vmem>>, vector<8x32x16xf32>
    %c0_2 = arith.constant 0 : index
    %c0_3 = arith.constant 0 : index
    %c0_4 = arith.constant 0 : index
    %1 = vector.load %arg2[%c0_2, %c0_3, %c0_4] : memref<8x32x16xf32, #tpu.memory_space<vmem>>, vector<8x32x16xf32>
    %c0_5 = arith.constant 0 : index
    %c0_6 = arith.constant 0 : index
    %2 = vector.load %arg3[%c0_5, %c0_6] : memref<32x16xf32, #tpu.memory_space<vmem>>, vector<32x16xf32>
    %3 = vector.shape_cast %2 : vector<32x16xf32> to vector<1x32x16xf32>
    %4 = vector.broadcast %3 : vector<1x32x16xf32> to vector<8x32x16xf32>
    %5 = arith.mulf %1, %4 : vector<8x32x16xf32>
    %cst = arith.constant dense<0.000000e+00> : vector<8x16xf32>
    %6 = vector.multi_reduction <add>, %5, %cst [1] : vector<8x32x16xf32> to vector<8x16xf32>
    %cst_7 = arith.constant dense<0xFF800000> : vector<16xf32>
    %7 = vector.multi_reduction <maximumf>, %6, %cst_7 [0] : vector<8x16xf32> to vector<16xf32>
    %8 = vector.shape_cast %7 : vector<16xf32> to vector<1x16xf32>
    %9 = vector.broadcast %8 : vector<1x16xf32> to vector<8x16xf32>
    %10 = arith.subf %6, %9 : vector<8x16xf32>
    %11 = math.exp %10 : vector<8x16xf32>
    %cst_8 = arith.constant dense<0.000000e+00> : vector<16xf32>
    %12 = vector.multi_reduction <add>, %11, %cst_8 [0] : vector<8x16xf32> to vector<16xf32>
    %13 = vector.shape_cast %12 : vector<16xf32> to vector<1x16xf32>
    %cst_9 = arith.constant 1.000000e+00 : f32
    %14 = vector.broadcast %cst_9 : f32 to vector<1x16xf32>
    %15 = arith.divf %14, %13 : vector<1x16xf32>
    %16 = vector.broadcast %15 : vector<1x16xf32> to vector<8x16xf32>
    %17 = arith.mulf %11, %16 : vector<8x16xf32>
    %18 = vector.shape_cast %17 : vector<8x16xf32> to vector<8x1x16xf32>
    %19 = vector.broadcast %18 : vector<8x1x16xf32> to vector<8x32x16xf32>
    %20 = arith.mulf %0, %19 : vector<8x32x16xf32>
    %cst_10 = arith.constant dense<0.000000e+00> : vector<32x16xf32>
    %21 = vector.multi_reduction <add>, %20, %cst_10 [0] : vector<8x32x16xf32> to vector<32x16xf32>
    %c0_11 = arith.constant 0 : index
    %c0_12 = arith.constant 0 : index
    %22 = vector.load %arg4[%c0_11, %c0_12] : memref<4x32xf32, #tpu.memory_space<vmem>>, vector<4x32xf32>
    %cst_13 = arith.constant dense<0.000000e+00> : vector<4x16xf32>
    %23 = tpu.matmul %22, %21, %cst_13 {dimension_numbers = #tpu.dot_dimension_numbers<[1], [0], [0], [1], [0, 0, 1, 1], [], []>} : vector<4x32xf32>, vector<32x16xf32>, vector<4x16xf32> -> vector<4x16xf32>
    %c0_14 = arith.constant 0 : index
    %c0_15 = arith.constant 0 : index
    %24 = vector.load %arg5[%c0_14, %c0_15] : memref<4x1xf32, #tpu.memory_space<vmem>>, vector<4x1xf32>
    %25 = vector.broadcast %24 : vector<4x1xf32> to vector<4x16xf32>
    %26 = arith.addf %23, %25 : vector<4x16xf32>
    %c0_16 = arith.constant 0 : index
    %c0_17 = arith.constant 0 : index
    %27 = vector.load %arg6[%c0_16, %c0_17] : memref<1x16xf32, #tpu.memory_space<vmem>>, vector<1x16xf32>
    %cst_18 = arith.constant 5.000000e-01 : f32
    %28 = vector.broadcast %cst_18 : f32 to vector<1x16xf32>
    %29 = arith.cmpf ogt, %27, %28 : vector<1x16xf32>
    %30 = vector.extract_strided_slice %26 {offsets = [0, 0], sizes = [2, 16], strides = [1, 1]} : vector<4x16xf32> to vector<2x16xf32>
    %31 = vector.extract_strided_slice %26 {offsets = [2, 0], sizes = [2, 16], strides = [1, 1]} : vector<4x16xf32> to vector<2x16xf32>
    %32 = vector.shape_cast %29 : vector<1x16xi1> to vector<1x16xi1>
    %33 = vector.broadcast %32 : vector<1x16xi1> to vector<2x16xi1>
    %34 = arith.select %33, %30, %31 : vector<2x16xi1>, vector<2x16xf32>
    %c0_19 = arith.constant 0 : index
    %c0_20 = arith.constant 0 : index
    %35 = vector.load %arg7[%c0_19, %c0_20] : memref<2x16xf32, #tpu.memory_space<vmem>>, vector<2x16xf32>
    tpu.vector_store %arg7[%c0_19, %c0_20], %34 {strides = array<i32>} : memref<2x16xf32, #tpu.memory_space<vmem>>, vector<2x16xf32>,
    return
  }
  func.func @transform_0(%arg0: i32) -> (i32, i32, i32) {
    %c0_i32 = arith.constant 0 : i32
    %c0_i32_0 = arith.constant 0 : i32
    %c0_i32_1 = arith.constant 0 : i32
    return %c0_i32, %c0_i32_0, %arg0 : i32, i32, i32
  }
  func.func @transform_1(%arg0: i32) -> (i32, i32, i32) {
    %c0_i32 = arith.constant 0 : i32
    %c0_i32_0 = arith.constant 0 : i32
    %c0_i32_1 = arith.constant 0 : i32
    return %c0_i32, %c0_i32_0, %arg0 : i32, i32, i32
  }
  func.func @transform_2(%arg0: i32) -> (i32, i32) {
    %c0_i32 = arith.constant 0 : i32
    %c0_i32_0 = arith.constant 0 : i32
    return %c0_i32, %arg0 : i32, i32
  }
  func.func @transform_3(%arg0: i32) -> (i32, i32) {
    %c0_i32 = arith.constant 0 : i32
    %c0_i32_0 = arith.constant 0 : i32
    %c0_i32_1 = arith.constant 0 : i32
    return %c0_i32, %c0_i32_0 : i32, i32
  }
  func.func @transform_4(%arg0: i32) -> (i32, i32) {
    %c0_i32 = arith.constant 0 : i32
    %c0_i32_0 = arith.constant 0 : i32
    %c0_i32_1 = arith.constant 0 : i32
    return %c0_i32, %c0_i32_0 : i32, i32
  }
  func.func @transform_5(%arg0: i32) -> (i32, i32) {
    %c0_i32 = arith.constant 0 : i32
    %c0_i32_0 = arith.constant 0 : i32
    return %c0_i32, %arg0 : i32, i32
  }
  func.func @transform_6(%arg0: i32) -> (i32, i32) {
    %c0_i32 = arith.constant 0 : i32
    %c0_i32_0 = arith.constant 0 : i32
    return %c0_i32, %arg0 : i32, i32
  }
}

</mosaic_0001>

<bundles_post_ra>
// kernel: tpu_custom_call.1
= control target key start
LH: loop header
LB: loop body
LE: loop exit
PB: predicated region body
PF: predicated region fallthrough
CT: control target
= control target key end

     0   :  { %s949_s0 = inlined_call_operand.vmem [shape: f32[8,32,16], index: 0, kind: input, shape index: {}]   ;;  %s950_s1 = inlined_call_operand.vmem [shape: f32[8,32,16], index: 1, kind: input, shape index: {}]   ;;  %s951_s2 = inlined_call_operand.vmem [shape: f32[32,16], index: 2, kind: input, shape index: {}]   ;;  %s952_s3 = inlined_call_operand.vmem [shape: f32[4,32], index: 3, kind: input, shape index: {}]   ;;  %s953_s4 = inlined_call_operand.vmem [shape: f32[4,1], index: 4, kind: input, shape index: {}]   ;;  %s954_s5 = inlined_call_operand.vmem [shape: f32[1,16], index: 5, kind: input, shape index: {}]   ;;  %s955_s6 = inlined_call_operand.hbm [shape: f32[2,16], index: 6, kind: output, shape index: {}]  }
   0x1   :  { %v56_v0 = vld [vmem:[%s950_s1] sm:$0xff]  ;;  %v57_v1 = vld [vmem:[%s950_s1 + $0x8] sm:$0xff]  ;;  %v58_v2 = vld [vmem:[%s950_s1 + $0x10] sm:$0xff] }
   0x2   :  { %v59_v3 = vld [vmem:[%s950_s1 + $0x18] sm:$0xff]  ;;  %v60_v4 = vld [vmem:[%s950_s1 + $0x20] sm:$0xff]  ;;  %v61_v5 = vld [vmem:[%s950_s1 + $0x28] sm:$0xff] }
   0x3   :  { %v62_v6 = vld [vmem:[%s950_s1 + $0x30] sm:$0xff]  ;;  %v63_v7 = vld [vmem:[%s950_s1 + $0x38] sm:$0xff]  ;;  %v64_v8 = vld [vmem:[%s950_s1 + $0x40] sm:$0xff] }
   0x4   :  { %v65_v9 = vld [vmem:[%s950_s1 + $0x48] sm:$0xff]  ;;  %v66_v10 = vld [vmem:[%s950_s1 + $0x50] sm:$0xff]  ;;  %v67_v11 = vld [vmem:[%s950_s1 + $0x58] sm:$0xff] }
   0x5   :  { %v68_v12 = vld [vmem:[%s950_s1 + $0x60] sm:$0xff]  ;;  %v69_v13 = vld [vmem:[%s950_s1 + $0x68] sm:$0xff]  ;;  %v627_v16 = vld [vmem:[%s951_s2 + $0x10] sm:$0xff] }
   0x6   :  { %v617_v14 = vld [vmem:[%s951_s2] sm:$0xff]  ;;  %v622_v15 = vld [vmem:[%s951_s2 + $0x8] sm:$0xff]  ;;  %v632_v17 = vld [vmem:[%s951_s2 + $0x18] sm:$0xff] }
   0x7   :  { %11 = vsyncpa [#allocation3], 0  ;;  %v70_v18 = vld [vmem:[%s950_s1 + $0x70] sm:$0xff]  ;;  %v71_v19 = vld [vmem:[%s950_s1 + $0x78] sm:$0xff]  ;;  %v92_v21 = vmul.f32 %v617_v14, %v56_v0  ;;  %v93_v22 = vmul.f32 %v622_v15, %v57_v1  ;;  %vm124_vm0 = vcmask 130048   ;;  %v94_v26 = vmul.f32 %v627_v16, %v58_v2  ;;  %s536_s10 = smov [#allocation2]  }
   0x8   :  { %v72_v20 = vld [vmem:[%s950_s1 + $0x80] sm:$0xff]  ;;  %v73_v23 = vld [vmem:[%s950_s1 + $0x88] sm:$0xff]  ;;  %v74_v24 = vld [vmem:[%s950_s1 + $0x90] sm:$0xff]  ;;  %v95_v27 = vmul.f32 %v632_v17, %v59_v3  ;;  %v96_v28 = vmul.f32 %v617_v14, %v60_v4  ;;  %v97_v29 = vmul.f32 %v622_v15, %v61_v5  ;;  %v98_v33 = vmul.f32 %v627_v16, %v62_v6  ;;  %s476_s11 = sshll.u32 %s536_s10, 4  ;;  %s478_s14 = sshll.u32 %s955_s6, 4  ;;  %s477_s11 = int_to_ptr.vmem [resolvable:$true] %s476_s11  ;;  %s479_s14 = int_to_ptr.hbm [resolvable:$true] %s478_s14 }
   0x9   :  { %v75_v25 = vld [vmem:[%s950_s1 + $0x98] sm:$0xff]  ;;  %v76_v30 = vld [vmem:[%s950_s1 + $0xa0] sm:$0xff]  ;;  %v77_v31 = vld [vmem:[%s950_s1 + $0xa8] sm:$0xff]  ;;  %v99_v34 = vmul.f32 %v632_v17, %v63_v7  ;;  %v100_v35 = vmul.f32 %v617_v14, %v64_v8  ;;  %v101_v36 = vmul.f32 %v622_v15, %v65_v9  ;;  %v102_v40 = vmul.f32 %v627_v16, %v66_v10 }
   0xa   :  { %v78_v32 = vld [vmem:[%s950_s1 + $0xb0] sm:$0xff]  ;;  %v79_v37 = vld [vmem:[%s950_s1 + $0xb8] sm:$0xff]  ;;  %v80_v38 = vld [vmem:[%s950_s1 + $0xc0] sm:$0xff]  ;;  %v103_v41 = vmul.f32 %v632_v17, %v67_v11  ;;  %v104_v42 = vmul.f32 %v617_v14, %v68_v12  ;;  %v105_v43 = vmul.f32 %v622_v15, %v69_v13  ;;  %v106_v44 = vmul.f32 %v627_v16, %v70_v18 }
   0xb   :  { %v81_v39 = vld [vmem:[%s950_s1 + $0xc8] sm:$0xff]  ;;  %v107_v45 = vmul.f32 %v632_v17, %v71_v19  ;;  %v108_v46 = vmul.f32 %v617_v14, %v72_v20  ;;  %v109_v47 = vmul.f32 %v622_v15, %v73_v23  ;;  %v110_v48 = vmul.f32 %v627_v16, %v74_v24  ;;  %v82_v24 = vld [vmem:[%s950_s1 + $0xd0] sm:$0xff] }
   0xc   :  { %v111_v49 = vmul.f32 %v632_v17, %v75_v25  ;;  %v112_v50 = vmul.f32 %v617_v14, %v76_v30  ;;  %v113_v51 = vmul.f32 %v622_v15, %v77_v31  ;;  %v114_v52 = vmul.f32 %v627_v16, %v78_v32 }
   0xd   :  { %v115_v53 = vmul.f32 %v632_v17, %v79_v37  ;;  %v116_v54 = vmul.f32 %v617_v14, %v80_v38  ;;  %v117_v55 = vmul.f32 %v622_v15, %v81_v39  ;;  %v125_v56 = vsel %vm124_vm0, %v92_v21, 0.0  ;;  %v84_v37 = vld [vmem:[%s950_s1 + $0xe0] sm:$0xff] }
   0xe   :  { %v126_v57 = vsel %vm124_vm0, %v93_v22, 0.0  ;;  %v128_v58 = vsel %vm124_vm0, %v94_v26, 0.0  ;;  %v130_v59 = vsel %vm124_vm0, %v95_v27, 0.0  ;;  %v138_v61 = vsel %vm124_vm0, %v96_v28, 0.0 }
   0xf   :  { %v127_v60 = vadd.f32 %v126_v57, %v125_v56  ;;  %v139_v62 = vsel %vm124_vm0, %v97_v29, 0.0  ;;  %v141_v63 = vsel %vm124_vm0, %v98_v33, 0.0  ;;  %v143_v1 = vsel %vm124_vm0, %v99_v34, 0.0  ;;  %v83_v33 = vld [vmem:[%s950_s1 + $0xd8] sm:$0xff] }
  0x10   :  { %v140_v0 = vadd.f32 %v139_v62, %v138_v61  ;;  %v151_v2 = vsel %vm124_vm0, %v100_v35, 0.0  ;;  %v152_v3 = vsel %vm124_vm0, %v101_v36, 0.0  ;;  %v154_v6 = vsel %vm124_vm0, %v102_v40, 0.0 }
  0x11   :  { %v129_v4 = vadd.f32 %v128_v58, %v127_v60  ;;  %v153_v5 = vadd.f32 %v152_v3, %v151_v2  ;;  %v156_v7 = vsel %vm124_vm0, %v103_v41, 0.0  ;;  %v164_v9 = vsel %vm124_vm0, %v104_v42, 0.0 }
  0x12   :  { %v142_v8 = vadd.f32 %v141_v63, %v140_v0  ;;  %v165_v10 = vsel %vm124_vm0, %v105_v43, 0.0  ;;  %v167_v11 = vsel %vm124_vm0, %v106_v44, 0.0  ;;  %v169_v19 = vsel %vm124_vm0, %v107_v45, 0.0 }
  0x13   :  { %v131_v12 = vadd.f32 %v130_v59, %v129_v4  ;;  %v155_v13 = vadd.f32 %v154_v6, %v153_v5  ;;  %v166_v18 = vadd.f32 %v165_v10, %v164_v9  ;;  %v177_v21 = vsel %vm124_vm0, %v108_v46, 0.0  ;;  %v85_v46 = vld [vmem:[%s950_s1 + $0xe8] sm:$0xff] }
  0x14   :  { %v144_v20 = vadd.f32 %v143_v1, %v142_v8  ;;  %v178_v22 = vsel %vm124_vm0, %v109_v47, 0.0  ;;  %v180_v23 = vsel %vm124_vm0, %v110_v48, 0.0  ;;  %v182_v30 = vsel %vm124_vm0, %v111_v49, 0.0 }
  0x15   :  { %v132_v25 = vrot.slane %v131_v12, 4  ;;  %v157_v26 = vadd.f32 %v156_v7, %v155_v13  ;;  %v168_v27 = vadd.f32 %v167_v11, %v166_v18  ;;  %v179_v28 = vadd.f32 %v178_v22, %v177_v21 }
  0x16   :  { %v145_v29 = vrot.slane %v144_v20, 4  ;;  %v190_v31 = vsel %vm124_vm0, %v112_v50, 0.0  ;;  %v191_v32 = vsel %vm124_vm0, %v113_v51, 0.0  ;;  %v118_v38 = vmul.f32 %v627_v16, %v82_v24  ;;  %v86_v51 = vld [vmem:[%s950_s1 + $0xf0] sm:$0xff] }
  0x17   :  { %v133_v34 = vadd.f32 %v132_v25, %v131_v12  ;;  %v170_v35 = vadd.f32 %v169_v19, %v168_v27  ;;  %v181_v36 = vadd.f32 %v180_v23, %v179_v28  ;;  %v158_v39 = vrot.slane %v157_v26, 4 }
  0x18   :  { %v192_v40 = vadd.f32 %v191_v32, %v190_v31  ;;  %v193_v41 = vsel %vm124_vm0, %v114_v52, 0.0  ;;  %v146_v42 = vadd.f32 %v145_v29, %v144_v20  ;;  %v195_v45 = vsel %vm124_vm0, %v115_v53, 0.0  ;;  %v87_v53 = vld [vmem:[%s950_s1 + $0xf8] sm:$0xff] }
  0x19   :  { %v171_v43 = vrot.slane %v170_v35, 4  ;;  %v183_v44 = vadd.f32 %v182_v30, %v181_v36  ;;  %v119_v47 = vmul.f32 %v632_v17, %v83_v33  ;;  %v203_v49 = vsel %vm124_vm0, %v116_v54, 0.0 }
  0x1a   :  { %v194_v48 = vadd.f32 %v193_v41, %v192_v40  ;;  %v204_v50 = vsel %vm124_vm0, %v117_v55, 0.0  ;;  %v120_v52 = vmul.f32 %v617_v14, %v84_v37  ;;  %v134_v56 = vrot.slane %v133_v34, 2 }
  0x1b   :  { %v184_v57 = vrot.slane %v183_v44, 4  ;;  %v159_v58 = vadd.f32 %v158_v39, %v157_v26  ;;  %v205_v60 = vadd.f32 %v204_v50, %v203_v49  ;;  %v206_v61 = vsel %vm124_vm0, %v118_v38, 0.0 }
  0x1c   :  { %v196_v59 = vadd.f32 %v195_v45, %v194_v48  ;;  %v121_v54 = vmul.f32 %v622_v15, %v85_v46  ;;  %v147_v55 = vrot.slane %v146_v42, 2  ;;  %v172_v62 = vadd.f32 %v171_v43, %v170_v35 }
  0x1d   :  { %v185_v63 = vadd.f32 %v184_v57, %v183_v44  ;;  %v122_v0 = vmul.f32 %v627_v16, %v86_v51  ;;  %v207_v14 = vadd.f32 %v206_v61, %v205_v60  ;;  %v208_v2 = vsel %vm124_vm0, %v119_v47, 0.0 }
  0x1e   :  { %v197_v1 = vrot.slane %v196_v59, 4  ;;  %v123_v3 = vmul.f32 %v632_v17, %v87_v53  ;;  %v135_v4 = vadd.f32 %v134_v56, %v133_v34  ;;  %v160_v6 = vrot.slane %v159_v58, 2 }
  0x1f   :  { %v186_v5 = vrot.slane %v185_v63, 2  ;;  %v209_v8 = vadd.f32 %v208_v2, %v207_v14  ;;  %v216_v9 = vsel %vm124_vm0, %v120_v52, 0.0  ;;  %v148_v10 = vadd.f32 %v147_v55, %v146_v42 }
  0x20   :  { %v198_v7 = vadd.f32 %v197_v1, %v196_v59  ;;  %v173_v15 = vrot.slane %v172_v62, 2  ;;  %v217_v12 = vsel %vm124_vm0, %v121_v54, 0.0  ;;  %v219_v19 = vsel %vm124_vm0, %v122_v0, 0.0 }
  0x21   :  { %v187_v11 = vadd.f32 %v186_v5, %v185_v63  ;;  %v210_v16 = vrot.slane %v209_v8, 4  ;;  %v218_v18 = vadd.f32 %v217_v12, %v216_v9  ;;  %v221_v20 = vsel %vm124_vm0, %v123_v3, 0.0 }
  0x22   :  { %v199_v13 = vrot.slane %v198_v7, 2  ;;  %v161_v17 = vadd.f32 %v160_v6, %v159_v58  ;;  %v136_v24 = vrot.slane %v135_v4, 1  ;;  %v149_v25 = vrot.slane %v148_v10, 1 }
  0x23   :  { %v211_v22 = vadd.f32 %v210_v16, %v209_v8  ;;  %v220_v23 = vadd.f32 %v219_v19, %v218_v18  ;;  %v174_v26 = vadd.f32 %v173_v15, %v172_v62  ;;  %v188_v27 = vrot.slane %v187_v11, 1 }
  0x24   :  { %v200_v21 = vadd.f32 %v199_v13, %v198_v7  ;;  %v162_v31 = vrot.slane %v161_v17, 1  ;;  %v137_v34 = vadd.f32 %v136_v24, %v135_v4  ;;  %v150_v35 = vadd.f32 %v149_v25, %v148_v10 }
  0x25   :  { %v212_v29 = vrot.slane %v211_v22, 2  ;;  %v222_v30 = vadd.f32 %v221_v20, %v220_v23  ;;  %v175_v36 = vrot.slane %v174_v26, 1  ;;  %v189_v37 = vadd.f32 %v188_v27, %v187_v11 }
  0x26   :  { %v201_v28 = vrot.slane %v200_v21, 1  ;;  %v163_v41 = vadd.f32 %v162_v31, %v161_v17  ;;  %v229_v45 = vsel %vm124_vm0, %v137_v34, -inf  ;;  %v230_v47 = vsel %vm124_vm0, %v150_v35, -inf }
  0x27   :  { %v213_v32 = vadd.f32 %v212_v29, %v211_v22  ;;  %v223_v33 = vrot.slane %v222_v30, 4  ;;  %v176_v44 = vadd.f32 %v175_v36, %v174_v26  ;;  %v233_v48 = vsel %vm124_vm0, %v189_v37, -inf }
  0x28   :  { %v202_v38 = vadd.f32 %v201_v28, %v200_v21  ;;  %v231_v51 = vsel %vm124_vm0, %v163_v41, -inf  ;;  %v234_v56 = vmax.f32 %v229_v45, %v233_v48  ;;  %vm277_vm1 = vcmask 1041409  }
  0x29   :  { %v214_v39 = vrot.slane %v213_v32, 1  ;;  %v224_v40 = vadd.f32 %v223_v33, %v222_v30  ;;  %v232_v58 = vsel %vm124_vm0, %v176_v44, -inf  ;;  %vm280_vm2 = vcmask 1042434  }
  0x2a   :  { %v235_v49 = vsel %vm124_vm0, %v202_v38, -inf  ;;  %vm283_vm3 = vcmask 1043459   ;;  %vm286_vm4 = vcmask 1044484   ;;  %vm289_vm5 = vcmask 1045509  }
  0x2b   :  { %v215_v42 = vadd.f32 %v214_v39, %v213_v32  ;;  %v225_v43 = vrot.slane %v224_v40, 2  ;;  %v236_v57 = vmax.f32 %v230_v47, %v235_v49  ;;  %vm292_vm6 = vcmask 1046534  }
  0x2c   :  { %vm295_vm7 = vcmask 1047559   ;;  %vm436_vm12 = vcmask 261120   ;;  %vm469_vm15 = vcmask 123904  }
  0x2d   :  { %v226_v46 = vadd.f32 %v225_v43, %v224_v40  ;;  %v237_v52 = vsel %vm124_vm0, %v215_v42, -inf  ;;  %v241_v54 = vmax.f32 %v234_v56, %v236_v57 }
  0x2e   :  { %v238_v59 = vmax.f32 %v231_v51, %v237_v52 }
  0x2f   :  { %v227_v50 = vrot.slane %v226_v46, 1 }
  0x31   :  { %v228_v53 = vadd.f32 %v227_v50, %v226_v46 }
  0x33   :  { %v239_v60 = vsel %vm124_vm0, %v228_v53, -inf }
  0x34   :  { %v240_v61 = vmax.f32 %v232_v58, %v239_v60 }
  0x36   :  { %v242_v55 = vmax.f32 %v238_v59, %v240_v61 }
  0x38   :  { %v243_v62 = vmax.f32 %v241_v54, %v242_v55  ;;  %v31_v54 = vld [vmem:[%s949_s0 + $0x38] sm:$0xff] }
  0x39   :  { %v35_v55 = vld [vmem:[%s949_s0 + $0x58] sm:$0xff] }
  0x3a   :  { %v244_v63 = vsub.f32 %v137_v34, %v243_v62  ;;  %v245_v0 = vsub.f32 %v150_v35, %v243_v62  ;;  %v246_v1 = vsub.f32 %v163_v41, %v243_v62  ;;  %v247_v14 = vsub.f32 %v176_v44, %v243_v62 }
  0x3b   :  { %v248_v2 = vsub.f32 %v189_v37, %v243_v62  ;;  %v249_v3 = vsub.f32 %v202_v38, %v243_v62  ;;  %v250_v4 = vsub.f32 %v215_v42, %v243_v62  ;;  %v251_v8 = vsub.f32 %v228_v53, %v243_v62  ;;  %v27_v53 = vld [vmem:[%s949_s0 + $0x18] sm:$0xff] }
  0x3c   :  { %v252_v5 = vmul.f32 1.442695, %v244_v63  ;;  %v254_v6 = vmul.f32 1.442695, %v245_v0  ;;  %v256_v7 = vmul.f32 1.442695, %v246_v1 }
  0x3d   :  { %v258_v9 = vmul.f32 1.442695, %v247_v14  ;;  %v260_v10 = vmul.f32 1.442695, %v248_v2  ;;  %v262_v15 = vmul.f32 1.442695, %v249_v3 }
  0x3e   :  { %491 = vpow2.f32 %v252_v5  ;;  %v264_v11 = vmul.f32 1.442695, %v250_v4  ;;  %v266_v12 = vmul.f32 1.442695, %v251_v8  ;;  %v39_v62 = vld [vmem:[%s949_s0 + $0x78] sm:$0xff] }
  0x3f   :  { %493 = vpow2.f32 %v254_v6  ;;  %v43_v6 = vld [vmem:[%s949_s0 + $0x98] sm:$0xff] }
  0x40   :  { %495 = vpow2.f32 %v256_v7 }
  0x41   :  { %497 = vpow2.f32 %v258_v9 }
  0x42   :  { %499 = vpow2.f32 %v260_v10  ;;  %v47_v10 = vld [vmem:[%s949_s0 + $0xb8] sm:$0xff] }
  0x43   :  { %501 = vpow2.f32 %v262_v15  ;;  %v51_v15 = vld [vmem:[%s949_s0 + $0xd8] sm:$0xff] }
  0x44   :  { %v492_v13 = vpop.eup %491  ;;  %503 = vpow2.f32 %v264_v11 }
  0x45   :  { %v494_v16 = vpop.eup %493  ;;  %505 = vpow2.f32 %v266_v12 }
  0x46   :  { %v496_v18 = vpop.eup %495  ;;  %v276_v19 = vrot.slane %v494_v16, 7 }
  0x47   :  { %v498_v20 = vpop.eup %497  ;;  %v279_v17 = vrot.slane %v496_v18, 6 }
  0x48   :  { %v500_v21 = vpop.eup %499  ;;  %v278_v22 = vsel %vm277_vm1, %v276_v19, %v492_v13  ;;  %v282_v23 = vrot.slane %v498_v20, 5  ;;  %v26_v19 = vld [vmem:[%s949_s0 + $0x10] sm:$0xff] }
  0x49   :  { %v502_v24 = vpop.eup %501  ;;  %v281_v25 = vsel %vm280_vm2, %v279_v17, %v278_v22  ;;  %v285_v26 = vrot.slane %v500_v21, 4  ;;  %v34_v17 = vld [vmem:[%s949_s0 + $0x50] sm:$0xff] }
  0x4a   :  { %v504_v27 = vpop.eup %503  ;;  %v284_v28 = vsel %vm283_vm3, %v282_v23, %v281_v25  ;;  %v288_v29 = vrot.slane %v502_v24, 3 }
  0x4b   :  { %v506_v30 = vpop.eup %505  ;;  %v287_v31 = vsel %vm286_vm4, %v285_v26, %v284_v28  ;;  %v291_v32 = vrot.slane %v504_v27, 2  ;;  %v38_v26 = vld [vmem:[%s949_s0 + $0x70] sm:$0xff] }
  0x4c   :  { %v290_v33 = vsel %vm289_vm5, %v288_v29, %v287_v31  ;;  %v294_v34 = vrot.slane %v506_v30, 1 }
  0x4d   :  { %v293_v35 = vsel %vm292_vm6, %v291_v32, %v290_v33  ;;  %v46_v32 = vld [vmem:[%s949_s0 + $0xb0] sm:$0xff] }
  0x4e   :  { %v296_v36 = vsel %vm295_vm7, %v294_v34, %v293_v35 }
  0x4f   :  { %v298_v37 = vsel %vm124_vm0, %v296_v36, 0.0 }
  0x50   :  { %v299_v38 = vrot.slane %v298_v37, 4 }
  0x52   :  { %v300_v39 = vadd.f32 %v299_v38, %v298_v37  ;;  %v50_v38 = vld [vmem:[%s949_s0 + $0xd0] sm:$0xff] }
  0x54   :  { %v301_v40 = vrot.slane %v300_v39, 2 }
  0x56   :  { %v302_v41 = vadd.f32 %v301_v40, %v300_v39 }
  0x58   :  { %v303_v42 = vrot.slane %v302_v41, 1 }
  0x5a   :  { %v304_v43 = vadd.f32 %v303_v42, %v302_v41 }
  0x5c   :  { %507 = vrcp.f32 %v304_v43  ;;  %v316_v46 = vand.u32 2147483648, %v304_v43  ;;  %vm310_vm8 = vweird.f32 %v304_v43  ;;  %v314_v48 = vand.u32 2147483647, %v304_v43 }
  0x5e   :  { %v317_v50 = vor.u32 1.1754944e-38, %v316_v46  ;;  %vm315_vm11 = vcmp.eq.f32.partialorder %v314_v48, 8.507059e+37 }
  0x62   :  { %v508_v44 = vpop.eup %507 }
  0x63   :  { %v306_v45 = vmul.f32 %v508_v44, %v304_v43  ;;  %vm311_vm9 = vweird.f32 %v508_v44 }
  0x64   :  { %vm312_vm10 = vmor %vm310_vm8, %vm311_vm9 }
  0x65   :  { %v307_v47 = vsub.f32 1.0, %v306_v45  ;;  %v29_v45 = vld [vmem:[%s949_s0 + $0x28] sm:$0xff] }
  0x67   :  { %v308_v49 = vmul.f32 %v508_v44, %v307_v47  ;;  %v54_v47 = vld [vmem:[%s949_s0 + $0xf0] sm:$0xff] }
  0x69   :  { %v309_v51 = vadd.f32 %v508_v44, %v308_v49 }
  0x6b   :  { %v313_v52 = vsel %vm312_vm10, %v508_v44, %v309_v51  ;;  %v25_v44 = vld [vmem:[%s949_s0 + $0x8] sm:$0xff] }
  0x6c   :  { %v318_v56 = vsel %vm315_vm11, %v317_v50, %v313_v52  ;;  %v33_v51 = vld [vmem:[%s949_s0 + $0x48] sm:$0xff] }
  0x6d   :  { %v320_v57 = vperm.slane %v318_v56, 0  ;;  %v37_v52 = vld [vmem:[%s949_s0 + $0x68] sm:$0xff] }
  0x6f   :  { %v321_v58 = vmul.f32 %v492_v13, %v320_v57  ;;  %v322_v59 = vmul.f32 %v494_v16, %v320_v57  ;;  %v323_v60 = vmul.f32 %v496_v18, %v320_v57  ;;  %v324_v61 = vmul.f32 %v498_v20, %v320_v57  ;;  %v30_v20 = vld [vmem:[%s949_s0 + $0x30] sm:$0xff] }
  0x70   :  { %v325_v63 = vmul.f32 %v500_v21, %v320_v57  ;;  %v326_v0 = vmul.f32 %v502_v24, %v320_v57  ;;  %v327_v1 = vmul.f32 %v504_v27, %v320_v57  ;;  %v328_v14 = vmul.f32 %v506_v30, %v320_v57  ;;  %v55_v21 = vld [vmem:[%s949_s0 + $0xf8] sm:$0xff]  ;;  %v42_v30 = vld [vmem:[%s949_s0 + $0x90] sm:$0xff] }
  0x71   :  { %v773_v2 = vperm.slane %v321_v58, 0  ;;  %v775_v3 = vperm.slane %v322_v59, 0  ;;  %v777_v4 = vperm.slane %v323_v60, 0  ;;  %v779_v5 = vperm.slane %v324_v61, 0  ;;  %v41_v61 = vld [vmem:[%s949_s0 + $0x88] sm:$0xff] }
  0x72   :  { %v784_v7 = vperm.slane %v325_v63, 0  ;;  %v786_v8 = vperm.slane %v326_v0, 0  ;;  %v788_v9 = vperm.slane %v327_v1, 0  ;;  %v800_v18 = vperm.slane %v328_v14, 0  ;;  %v45_v0 = vld [vmem:[%s949_s0 + $0xa8] sm:$0xff] }
  0x73   :  { %v340_v11 = vmul.f32 %v773_v2, %v27_v53  ;;  %v344_v12 = vmul.f32 %v775_v3, %v31_v54  ;;  %v348_v13 = vmul.f32 %v777_v4, %v35_v55  ;;  %v352_v16 = vmul.f32 %v779_v5, %v39_v62 }
  0x74   :  { %v356_v22 = vmul.f32 %v784_v7, %v43_v6  ;;  %v360_v27 = vmul.f32 %v786_v8, %v47_v10  ;;  %v364_v28 = vmul.f32 %v788_v9, %v51_v15  ;;  %v339_v33 = vmul.f32 %v773_v2, %v26_v19 }
  0x75   :  { %v414_v23 = vsel %vm124_vm0, %v340_v11, 0.0  ;;  %v415_v24 = vsel %vm124_vm0, %v344_v12, 0.0  ;;  %v417_v25 = vsel %vm124_vm0, %v348_v13, 0.0  ;;  %v419_v31 = vsel %vm124_vm0, %v352_v16, 0.0  ;;  %v24_v12 = vld [vmem:[%s949_s0] sm:$0xff] }
  0x76   :  { %v416_v29 = vadd.f32 %v415_v24, %v414_v23  ;;  %v343_v34 = vmul.f32 %v775_v3, %v30_v20  ;;  %v347_v35 = vmul.f32 %v777_v4, %v34_v17  ;;  %v368_v36 = vmul.f32 %v800_v18, %v55_v21  ;;  %v28_v17 = vld [vmem:[%s949_s0 + $0x20] sm:$0xff]  ;;  %v49_v23 = vld [vmem:[%s949_s0 + $0xc8] sm:$0xff] }
  0x77   :  { %v351_v39 = vmul.f32 %v779_v5, %v38_v26  ;;  %v421_v40 = vsel %vm124_vm0, %v356_v22, 0.0  ;;  %v355_v41 = vmul.f32 %v784_v7, %v42_v30  ;;  %v399_v42 = vsel %vm124_vm0, %v339_v33, 0.0  ;;  %v32_v26 = vld [vmem:[%s949_s0 + $0x40] sm:$0xff]  ;;  %v53_v30 = vld [vmem:[%s949_s0 + $0xe8] sm:$0xff] }
  0x78   :  { %v418_v37 = vadd.f32 %v417_v25, %v416_v29  ;;  %v400_v43 = vsel %vm124_vm0, %v343_v34, 0.0  ;;  %v359_v48 = vmul.f32 %v786_v8, %v46_v32  ;;  %v402_v50 = vsel %vm124_vm0, %v347_v35, 0.0 }
  0x79   :  { %v401_v49 = vadd.f32 %v400_v43, %v399_v42  ;;  %v423_v56 = vsel %vm124_vm0, %v360_v27, 0.0  ;;  %v425_v57 = vsel %vm124_vm0, %v364_v28, 0.0  ;;  %v363_v53 = vmul.f32 %v788_v9, %v50_v38  ;;  %v36_v27 = vld [vmem:[%s949_s0 + $0x60] sm:$0xff] }
  0x7a   :  { %v420_v46 = vadd.f32 %v419_v31, %v418_v37  ;;  %v404_v58 = vsel %vm124_vm0, %v351_v39, 0.0  ;;  %v338_v54 = vmul.f32 %v773_v2, %v25_v44  ;;  %v342_v55 = vmul.f32 %v775_v3, %v29_v45  ;;  %v44_v45 = vld [vmem:[%s949_s0 + $0xa0] sm:$0xff] }
  0x7b   :  { %v403_v60 = vadd.f32 %v402_v50, %v401_v49  ;;  %v367_v62 = vmul.f32 %v800_v18, %v54_v47  ;;  %v406_v63 = vsel %vm124_vm0, %v355_v41, 0.0  ;;  %v346_v1 = vmul.f32 %v777_v4, %v33_v51  ;;  %v48_v49 = vld [vmem:[%s949_s0 + $0xc0] sm:$0xff] }
  0x7c   :  { %v422_v59 = vadd.f32 %v421_v40, %v420_v46  ;;  %v350_v14 = vmul.f32 %v779_v5, %v37_v52  ;;  %v427_v10 = vsel %vm124_vm0, %v368_v36, 0.0  ;;  %v408_v11 = vsel %vm124_vm0, %v359_v48, 0.0  ;;  %v40_v36 = vld [vmem:[%s949_s0 + $0x80] sm:$0xff] }
  0x7d   :  { %v405_v15 = vadd.f32 %v404_v58, %v403_v60  ;;  %v354_v13 = vmul.f32 %v784_v7, %v41_v61  ;;  %v384_v16 = vsel %vm124_vm0, %v338_v54, 0.0  ;;  %v385_v19 = vsel %vm124_vm0, %v342_v55, 0.0 }
  0x7e   :  { %v424_v6 = vadd.f32 %v423_v56, %v422_v59  ;;  %v387_v20 = vsel %vm124_vm0, %v346_v1, 0.0  ;;  %v358_v24 = vmul.f32 %v786_v8, %v45_v0  ;;  %v386_v25 = vadd.f32 %v385_v19, %v384_v16 }
  0x7f   :  { %v407_v22 = vadd.f32 %v406_v63, %v405_v15  ;;  %v410_v28 = vsel %vm124_vm0, %v363_v53, 0.0  ;;  %v412_v29 = vsel %vm124_vm0, %v367_v62, 0.0  ;;  %v389_v31 = vsel %vm124_vm0, %v350_v14, 0.0  ;;  %v52_v53 = vld [vmem:[%s949_s0 + $0xe0] sm:$0xff] }
  0x80   :  { %v426_v21 = vadd.f32 %v425_v57, %v424_v6  ;;  %v337_v32 = vmul.f32 %v773_v2, %v24_v12  ;;  %v388_v35 = vadd.f32 %v387_v20, %v386_v25  ;;  %v341_v37 = vmul.f32 %v775_v3, %v28_v17 }
  0x81   :  { %v409_v34 = vadd.f32 %v408_v11, %v407_v22  ;;  %v362_v38 = vmul.f32 %v788_v9, %v49_v23  ;;  %v391_v39 = vsel %vm124_vm0, %v354_v13, 0.0  ;;  %v345_v40 = vmul.f32 %v777_v4, %v32_v26  ;;  %v429_v11 = vld [vmem:[%s952_s3] sm:$0xf] }
  0x82   :  { %v428_v33 = vadd.f32 %v427_v10, %v426_v21  ;;  %v349_v41 = vmul.f32 %v779_v5, %v36_v27  ;;  %v366_v2 = vmul.f32 %v800_v18, %v53_v30  ;;  %v390_v43 = vadd.f32 %v389_v31, %v388_v35 }
  0x83   :  { %v411_v42 = vadd.f32 %v410_v28, %v409_v34  ;;  %v393_v44 = vsel %vm124_vm0, %v358_v24, 0.0  ;;  %v353_v3 = vmul.f32 %v784_v7, %v40_v36  ;;  %v369_v46 = vsel %vm124_vm0, %v337_v32, 0.0  ;;  %v430_v7 = vld [vmem:[%s953_s4] sm:$0xf] }
  0x84   :  { %452 = vmatpush.msra.mxu0 %v428_v33  ;;  %v370_v47 = vsel %vm124_vm0, %v341_v37, 0.0  ;;  %v372_v4 = vsel %vm124_vm0, %v345_v40, 0.0  ;;  %v392_v48 = vadd.f32 %v391_v39, %v390_v43  ;;  %v395_v51 = vsel %vm124_vm0, %v362_v38, 0.0 }
  0x85   :  { %v413_v5 = vadd.f32 %v412_v29, %v411_v42  ;;  %v371_v50 = vadd.f32 %v370_v47, %v369_v46  ;;  %v357_v52 = vmul.f32 %v786_v8, %v44_v45  ;;  %v374_v56 = vsel %vm124_vm0, %v349_v41, 0.0 }
  0x86   :  { %v394_v57 = vadd.f32 %v393_v44, %v392_v48  ;;  %v397_v59 = vsel %vm124_vm0, %v366_v2, 0.0  ;;  %v361_v60 = vmul.f32 %v788_v9, %v48_v49  ;;  %v376_v61 = vsel %vm124_vm0, %v353_v3, 0.0 }
  0x87   :  { %453 = vmatpush.msra.mxu0 %v413_v5  ;;  %v373_v58 = vadd.f32 %v372_v4, %v371_v50  ;;  %v535_v8 = vmov 0   ;;  %v365_v62 = vmul.f32 %v800_v18, %v52_v53  ;;  %v378_v63 = vsel %vm124_vm0, %v357_v52, 0.0  ;;  %v460_v18 = vld [vmem:[%s954_s5] sm:$0x1] }
  0x88   :  { %490 = vset.pattern.permute.xlu0 %v535_v8  ;;  %v396_v54 = vadd.f32 %v395_v51, %v394_v57  ;;  %v380_v14 = vsel %vm124_vm0, %v361_v60, 0.0  ;;  %vm461_vm13 = vcmp.gt.f32.partialorder %v460_v18, 0.5 }
  0x89   :  { %v375_v55 = vadd.f32 %v374_v56, %v373_v58  ;;  %433 = vperm.xlu0 %490, %v430_v7   ;;  %v382_v10 = vsel %vm124_vm0, %v365_v62, 0.0  ;;  %v462_v12 = vsel %vm461_vm13, 1, %v535_v8 }
  0x8a   :  { %v398_v0 = vadd.f32 %v397_v59, %v396_v54  ;;  %v463_v13 = vperm.slane %v462_v12, 0 }
  0x8b   :  { %v377_v1 = vadd.f32 %v376_v61, %v375_v55 }
  0x8c   :  { %454 = vmatpush.msra.mxu0 %v398_v0  ;;  %vm464_vm14 = vcmp.eq.s32.totalorder %v463_v13, 1 }
  0x8d   :  { %v379_v6 = vadd.f32 %v378_v63, %v377_v1 }
  0x8f   :  { %v381_v9 = vadd.f32 %v380_v14, %v379_v6 }
  0x91   :  { %v383_v15 = vadd.f32 %v382_v10, %v381_v9 }
  0x93   :  { %455 = vmatpush.msra.mxu0 %v383_v15 }
  0x94   :  { %487 = vmatmul.msk.f32.vlgmr.msra.gmra.mxu0 %vm436_vm12, %v429_v11 }
  0xfb   :  { %v434_v16 = vpop.permute.xlu0 %433 }
 0x111   :  { %v457_v19 = vpop.f32.mrf.mxu0 }
 0x112   :  { %v458_v20 = vadd.f32 %v457_v19, %v434_v16 }
 0x114   :  { %v466_v17 = vrot.slane %v458_v20, 2 }
 0x116   :  { %v468_v21 = vsel %vm464_vm14, %v458_v20, %v466_v17 }
 0x117   :  { %470 = vst.msk [vmem:[#allocation2] sm:$0x3] %vm469_vm15, %v468_v21 }
 0x118   :  { %481 = dma.vmem_to_hbm [thread:$0]  %s477_s11, 32, %s479_s14, [#allocation3]  }
 0x119   :  { %533 = dma.done.wait [#allocation3], 32  }
 0x11a   :  { %534 = vsyncadd [#allocation3], 4294967264 }
 0x11b   :  { %486 = vsyncpa [#allocation3], 1 }

</bundles_post_ra>
